<compile_context>
chip_gen: v6e
topology: v6e:2x2x1
jax: 0.10.0
libtpu: 0.0.40
codegen_flags: <defaults>
</compile_context>

<pallas_src>
import jax
import jax.numpy as jnp
from jax.experimental import pallas as pl
from jax.experimental.pallas import tpu as pltpu

_Q_COLS = 128  # lane width of the final (mostly-zero, VMEM-resident) weight block


def _qnn_kernel(z_ref, a_ref,
                w1z_ref, w1a_ref, b1_ref,
                w2_ref, b2_ref,
                w3_ref, b3_ref,
                out_ref):
    """One batch tile of the fused twin-Q MLP: out = min(Q1, Q2)."""
    f32 = jnp.float32
    # Layer 1: split-K matmul (z / a kept separate -> no wrapper-side concat).
    h = (jnp.dot(z_ref[...], w1z_ref[...], preferred_element_type=f32)
         + jnp.dot(a_ref[...], w1a_ref[...], preferred_element_type=f32)
         + b1_ref[...])
    h = jnp.maximum(h, 0.0).astype(w2_ref.dtype)                 # (tile, 2*H1)
    # Layer 2: block-diagonal weights -> both heads in one MXU pass.
    h = jnp.dot(h, w2_ref[...], preferred_element_type=f32) + b2_ref[...]
    h = jnp.maximum(h, 0.0).astype(w3_ref.dtype)                 # (tile, 2*H2)
    # Layer 3: only columns 0 (Q1) and 1 (Q2) are live; rest is zero padding.
    q = jnp.dot(h, w3_ref[...], preferred_element_type=f32) + b3_ref[...]
    out_ref[...] = jnp.minimum(q[:, 0:1], q[:, 1:2]).astype(out_ref.dtype)


def _round_up(x, m):
    return ((x + m - 1) // m) * m


def _pick_batch_tile(B):
    # Multiple of 16 (bf16 sublane pack).  Small B: one tile.  Mid B: two grid
    # steps so v7x megacore has work on both TensorCores.  Large B: 1024-row
    # tiles to amortize per-grid-step overhead (working set << VMEM everywhere).
    if B <= 256:
        return _round_up(max(B, 16), 16)
    if B <= 2048:
        return _round_up(pl.cdiv(B, 2), 16)
    return 1024


def _fuse_params(params, latent_dim, compute_dtype):
    """Stack / block-diagonalize the twin-head weights for the fused kernel."""
    p1, p2 = params["q1"], params["q2"]
    h1 = p1["w1"].shape[1]   # 64
    h2 = p1["w2"].shape[1]   # 128
    f32 = jnp.float32

    # Layer 1: stack heads along the output dim, then split K into (z, a) parts.
    w1 = jnp.concatenate([p1["w1"], p2["w1"]], axis=1)           # (in_dim, 2*h1)
    w1z = w1[:latent_dim].astype(compute_dtype)
    w1a = w1[latent_dim:].astype(compute_dtype)
    b1 = jnp.concatenate([p1["b1"], p2["b1"]])[None, :].astype(f32)

    # Layer 2: block-diagonal.
    w2 = jnp.zeros((2 * h1, 2 * h2), f32)
    w2 = w2.at[:h1, :h2].set(p1["w2"]).at[h1:, h2:].set(p2["w2"])
    w2 = w2.astype(compute_dtype)
    b2 = jnp.concatenate([p1["b2"], p2["b2"]])[None, :].astype(f32)

    # Layer 3: columns 0/1 of a 128-lane block hold w3 of Q1/Q2 (rest zero; the
    # padding lives only in VMEM-resident weights, not in the HBM output).
    w3 = jnp.zeros((2 * h2, _Q_COLS), f32)
    w3 = w3.at[:h2, 0].set(p1["w3"][:, 0]).at[h2:, 1].set(p2["w3"][:, 0])
    w3 = w3.astype(compute_dtype)
    b3 = jnp.zeros((1, _Q_COLS), f32)
    b3 = b3.at[0, 0].set(p1["b3"][0]).at[0, 1].set(p2["b3"][0])

    return (w1z, w1a, b1, w2, b2, w3, b3), h1, h2


def qnn_forward(latent_z, action, params, *, batch_tile=None,
                compute_dtype=jnp.bfloat16):
    """Pallas forward for QNN: (B, latent), (B, action) -> (B, 1) = min(Q1, Q2)."""
    B, latent_dim = latent_z.shape
    _, action_dim = action.shape
    out_dtype = latent_z.dtype

    if batch_tile is None:
        batch_tile = _pick_batch_tile(B)
    n_tiles = pl.cdiv(B, batch_tile)
    Bp = n_tiles * batch_tile

    z = latent_z.astype(compute_dtype)
    a = action.astype(compute_dtype)
    if Bp != B:
        # Ragged last tile: pad with zero rows (discarded by the slice below).
        z = jnp.pad(z, ((0, Bp - B), (0, 0)))
        a = jnp.pad(a, ((0, Bp - B), (0, 0)))

    (w1z, w1a, b1, w2, b2, w3, b3), h1, h2 = _fuse_params(
        params, latent_dim, compute_dtype)

    batch_map = lambda i: (i, 0)
    const_map = lambda i: (0, 0)   # weights resident in VMEM across grid steps

    out = pl.pallas_call(
        _qnn_kernel,
        out_shape=jax.ShapeDtypeStruct((Bp, 1), out_dtype),
        grid_spec=pltpu.PrefetchScalarGridSpec(
            num_scalar_prefetch=0,
            grid=(n_tiles,),
            in_specs=[
                pl.BlockSpec((batch_tile, latent_dim), batch_map),   # z
                pl.BlockSpec((batch_tile, action_dim), batch_map),   # a
                pl.BlockSpec((latent_dim, 2 * h1), const_map),       # W1[:latent]
                pl.BlockSpec((action_dim, 2 * h1), const_map),       # W1[latent:]
                pl.BlockSpec((1, 2 * h1), const_map),                # b1
                pl.BlockSpec((2 * h1, 2 * h2), const_map),           # W2 block-diag
                pl.BlockSpec((1, 2 * h2), const_map),                # b2
                pl.BlockSpec((2 * h2, _Q_COLS), const_map),          # W3 (cols 0/1)
                pl.BlockSpec((1, _Q_COLS), const_map),               # b3 (cols 0/1)
            ],
            out_specs=pl.BlockSpec((batch_tile, 1), batch_map),
        ),
        compiler_params=pltpu.CompilerParams(
            dimension_semantics=("parallel",)),
    )(z, a, w1z, w1a, b1, w2, b2, w3, b3)

    return out[:B]


def init_params(key, latent_dim, action_dim, dtype=jnp.float32):
    """Deterministic init matching nn.Linear defaults (uniform +/- 1/sqrt(fan_in))."""
    # TODO(synk): the original module applies utils.weight_init (not available
    # here); standard nn.Linear-style init is used instead.
    in_dim = latent_dim + action_dim
    dims = [(in_dim, 64), (64, 128), (128, 1)]

    def head(k):
        p = {}
        for i, (fan_in, fan_out) in enumerate(dims, start=1):
            k, kw, kb = jax.random.split(k, 3)
            bound = 1.0 / jnp.sqrt(fan_in)
            p[f"w{i}"] = jax.random.uniform(
                kw, (fan_in, fan_out), dtype, minval=-bound, maxval=bound)
            p[f"b{i}"] = jax.random.uniform(
                kb, (fan_out,), dtype, minval=-bound, maxval=bound)
        return p

    k1, k2 = jax.random.split(key)
    return {"q1": head(k1), "q2": head(k2)}


def _reference_forward(latent_z, action, params):
    x = jnp.concatenate([latent_z, action], axis=-1)

    def head(p):
        h = jnp.maximum(x @ p["w1"] + p["b1"], 0.0)
        h = jnp.maximum(h @ p["w2"] + p["b2"], 0.0)
        return h @ p["w3"] + p["b3"]

    return jnp.minimum(head(params["q1"]), head(params["q2"]))


if __name__ == "__main__":
    latent_dim, action_dim, batch = 32, 8, 8

    key = jax.random.PRNGKey(0)
    kp, kz, ka = jax.random.split(key, 3)
    params = init_params(kp, latent_dim, action_dim)
    latent_z = jax.random.normal(kz, (batch, latent_dim), jnp.float32)
    action = jax.random.normal(ka, (batch, action_dim), jnp.float32)

    ref = _reference_forward(latent_z, action, params)

    # f32 compute path: tight check of the fused-weight kernel structure.
    out_f32 = jax.block_until_ready(
        qnn_forward(latent_z, action, params, compute_dtype=jnp.float32))
    assert out_f32.shape == (batch, 1), out_f32.shape
    assert jnp.allclose(out_f32, ref, atol=1e-4, rtol=1e-4), "f32 mismatch vs reference"

    # Default bf16 path (bf16 inputs/weights, f32 accumulation).
    out_bf16 = jax.block_until_ready(qnn_forward(latent_z, action, params))
    assert out_bf16.shape == (batch, 1), out_bf16.shape
    assert jnp.allclose(out_bf16, ref, atol=2e-2, rtol=2e-2), "bf16 mismatch vs reference"

    print("KERNEL_OK")
</pallas_src>

<mosaic_0001>
module attributes {stable_mosaic.version = 11 : i64} {
  func.func @_qnn_kernel(%arg0: i32, %arg1: memref<16x32xf32, #tpu.memory_space<vmem>>, %arg2: memref<16x8xf32, #tpu.memory_space<vmem>>, %arg3: memref<32x128xf32, #tpu.memory_space<vmem>>, %arg4: memref<8x128xf32, #tpu.memory_space<vmem>>, %arg5: memref<1x128xf32, #tpu.memory_space<vmem>>, %arg6: memref<128x256xf32, #tpu.memory_space<vmem>>, %arg7: memref<1x256xf32, #tpu.memory_space<vmem>>, %arg8: memref<256x128xf32, #tpu.memory_space<vmem>>, %arg9: memref<1x128xf32, #tpu.memory_space<vmem>>, %arg10: memref<16x1xf32, #tpu.memory_space<vmem>>) attributes {dimension_semantics = [#tpu.dimension_semantics<parallel>], iteration_bounds = array<i64: 1>, scalar_prefetch = 0 : i64, scratch_operands = 0 : i64, tpu.core_type = #tpu.core_type<tc>, window_params = [{transform_indices = @transform_0, window_bounds = array<i64: 16, 32>}, {transform_indices = @transform_1, window_bounds = array<i64: 16, 8>}, {pipeline_mode = #tpu.pipeline_mode<synchronous>, transform_indices = @transform_2, window_bounds = array<i64: 32, 128>}, {pipeline_mode = #tpu.pipeline_mode<synchronous>, transform_indices = @transform_3, window_bounds = array<i64: 8, 128>}, {pipeline_mode = #tpu.pipeline_mode<synchronous>, transform_indices = @transform_4, window_bounds = array<i64: 1, 128>}, {pipeline_mode = #tpu.pipeline_mode<synchronous>, transform_indices = @transform_5, window_bounds = array<i64: 128, 256>}, {pipeline_mode = #tpu.pipeline_mode<synchronous>, transform_indices = @transform_6, window_bounds = array<i64: 1, 256>}, {pipeline_mode = #tpu.pipeline_mode<synchronous>, transform_indices = @transform_7, window_bounds = array<i64: 256, 128>}, {pipeline_mode = #tpu.pipeline_mode<synchronous>, transform_indices = @transform_8, window_bounds = array<i64: 1, 128>}, {transform_indices = @transform_9, window_bounds = array<i64: 16, 1>}]} {
    %c0 = arith.constant 0 : index
    %c0_0 = arith.constant 0 : index
    %0 = vector.load %arg1[%c0, %c0_0] : memref<16x32xf32, #tpu.memory_space<vmem>>, vector<16x32xf32>
    %c0_1 = arith.constant 0 : index
    %c0_2 = arith.constant 0 : index
    %1 = vector.load %arg3[%c0_1, %c0_2] : memref<32x128xf32, #tpu.memory_space<vmem>>, vector<32x128xf32>
    %cst = arith.constant dense<0.000000e+00> : vector<16x128xf32>
    %2 = tpu.matmul %0, %1, %cst {dimension_numbers = #tpu.dot_dimension_numbers<[1], [0], [0], [1], [0, 0, 1, 1], [], []>} : vector<16x32xf32>, vector<32x128xf32>, vector<16x128xf32> -> vector<16x128xf32>
    %c0_3 = arith.constant 0 : index
    %c0_4 = arith.constant 0 : index
    %3 = vector.load %arg2[%c0_3, %c0_4] : memref<16x8xf32, #tpu.memory_space<vmem>>, vector<16x8xf32>
    %c0_5 = arith.constant 0 : index
    %c0_6 = arith.constant 0 : index
    %4 = vector.load %arg4[%c0_5, %c0_6] : memref<8x128xf32, #tpu.memory_space<vmem>>, vector<8x128xf32>
    %cst_7 = arith.constant dense<0.000000e+00> : vector<16x128xf32>
    %5 = tpu.matmul %3, %4, %cst_7 {dimension_numbers = #tpu.dot_dimension_numbers<[1], [0], [0], [1], [0, 0, 1, 1], [], []>} : vector<16x8xf32>, vector<8x128xf32>, vector<16x128xf32> -> vector<16x128xf32>
    %6 = arith.addf %2, %5 : vector<16x128xf32>
    %c0_8 = arith.constant 0 : index
    %c0_9 = arith.constant 0 : index
    %7 = vector.load %arg5[%c0_8, %c0_9] : memref<1x128xf32, #tpu.memory_space<vmem>>, vector<1x128xf32>
    %8 = vector.broadcast %7 : vector<1x128xf32> to vector<16x128xf32>
    %9 = arith.addf %6, %8 : vector<16x128xf32>
    %cst_10 = arith.constant 0.000000e+00 : f32
    %10 = vector.broadcast %cst_10 : f32 to vector<16x128xf32>
    %11 = arith.maximumf %9, %10 : vector<16x128xf32>
    %c0_11 = arith.constant 0 : index
    %c0_12 = arith.constant 0 : index
    %12 = vector.load %arg6[%c0_11, %c0_12] : memref<128x256xf32, #tpu.memory_space<vmem>>, vector<128x256xf32>
    %cst_13 = arith.constant dense<0.000000e+00> : vector<16x256xf32>
    %13 = tpu.matmul %11, %12, %cst_13 {dimension_numbers = #tpu.dot_dimension_numbers<[1], [0], [0], [1], [0, 0, 1, 1], [], []>} : vector<16x128xf32>, vector<128x256xf32>, vector<16x256xf32> -> vector<16x256xf32>
    %c0_14 = arith.constant 0 : index
    %c0_15 = arith.constant 0 : index
    %14 = vector.load %arg7[%c0_14, %c0_15] : memref<1x256xf32, #tpu.memory_space<vmem>>, vector<1x256xf32>
    %15 = vector.broadcast %14 : vector<1x256xf32> to vector<16x256xf32>
    %16 = arith.addf %13, %15 : vector<16x256xf32>
    %cst_16 = arith.constant 0.000000e+00 : f32
    %17 = vector.broadcast %cst_16 : f32 to vector<16x256xf32>
    %18 = arith.maximumf %16, %17 : vector<16x256xf32>
    %c0_17 = arith.constant 0 : index
    %c0_18 = arith.constant 0 : index
    %19 = vector.load %arg8[%c0_17, %c0_18] : memref<256x128xf32, #tpu.memory_space<vmem>>, vector<256x128xf32>
    %cst_19 = arith.constant dense<0.000000e+00> : vector<16x128xf32>
    %20 = tpu.matmul %18, %19, %cst_19 {dimension_numbers = #tpu.dot_dimension_numbers<[1], [0], [0], [1], [0, 0, 1, 1], [], []>} : vector<16x256xf32>, vector<256x128xf32>, vector<16x128xf32> -> vector<16x128xf32>
    %c0_20 = arith.constant 0 : index
    %c0_21 = arith.constant 0 : index
    %21 = vector.load %arg9[%c0_20, %c0_21] : memref<1x128xf32, #tpu.memory_space<vmem>>, vector<1x128xf32>
    %22 = vector.broadcast %21 : vector<1x128xf32> to vector<16x128xf32>
    %23 = arith.addf %20, %22 : vector<16x128xf32>
    %24 = vector.extract_strided_slice %23 {offsets = [0, 0], sizes = [16, 1], strides = [1, 1]} : vector<16x128xf32> to vector<16x1xf32>
    %25 = vector.extract_strided_slice %23 {offsets = [0, 1], sizes = [16, 1], strides = [1, 1]} : vector<16x128xf32> to vector<16x1xf32>
    %26 = arith.minimumf %24, %25 : vector<16x1xf32>
    %c0_22 = arith.constant 0 : index
    %c0_23 = arith.constant 0 : index
    %27 = vector.load %arg10[%c0_22, %c0_23] : memref<16x1xf32, #tpu.memory_space<vmem>>, vector<16x1xf32>
    tpu.vector_store %arg10[%c0_22, %c0_23], %26 {strides = array<i32>} : memref<16x1xf32, #tpu.memory_space<vmem>>, vector<16x1xf32>,
    return
  }
  func.func @transform_0(%arg0: i32) -> (i32, i32) {
    %c0_i32 = arith.constant 0 : i32
    %c0_i32_0 = arith.constant 0 : i32
    return %arg0, %c0_i32 : i32, i32
  }
  func.func @transform_1(%arg0: i32) -> (i32, i32) {
    %c0_i32 = arith.constant 0 : i32
    %c0_i32_0 = arith.constant 0 : i32
    return %arg0, %c0_i32 : i32, i32
  }
  func.func @transform_2(%arg0: i32) -> (i32, i32) {
    %c0_i32 = arith.constant 0 : i32
    %c0_i32_0 = arith.constant 0 : i32
    %c0_i32_1 = arith.constant 0 : i32
    return %c0_i32, %c0_i32_0 : i32, i32
  }
  func.func @transform_3(%arg0: i32) -> (i32, i32) {
    %c0_i32 = arith.constant 0 : i32
    %c0_i32_0 = arith.constant 0 : i32
    %c0_i32_1 = arith.constant 0 : i32
    return %c0_i32, %c0_i32_0 : i32, i32
  }
  func.func @transform_4(%arg0: i32) -> (i32, i32) {
    %c0_i32 = arith.constant 0 : i32
    %c0_i32_0 = arith.constant 0 : i32
    %c0_i32_1 = arith.constant 0 : i32
    return %c0_i32, %c0_i32_0 : i32, i32
  }
  func.func @transform_5(%arg0: i32) -> (i32, i32) {
    %c0_i32 = arith.constant 0 : i32
    %c0_i32_0 = arith.constant 0 : i32
    %c0_i32_1 = arith.constant 0 : i32
    return %c0_i32, %c0_i32_0 : i32, i32
  }
  func.func @transform_6(%arg0: i32) -> (i32, i32) {
    %c0_i32 = arith.constant 0 : i32
    %c0_i32_0 = arith.constant 0 : i32
    %c0_i32_1 = arith.constant 0 : i32
    return %c0_i32, %c0_i32_0 : i32, i32
  }
  func.func @transform_7(%arg0: i32) -> (i32, i32) {
    %c0_i32 = arith.constant 0 : i32
    %c0_i32_0 = arith.constant 0 : i32
    %c0_i32_1 = arith.constant 0 : i32
    return %c0_i32, %c0_i32_0 : i32, i32
  }
  func.func @transform_8(%arg0: i32) -> (i32, i32) {
    %c0_i32 = arith.constant 0 : i32
    %c0_i32_0 = arith.constant 0 : i32
    %c0_i32_1 = arith.constant 0 : i32
    return %c0_i32, %c0_i32_0 : i32, i32
  }
  func.func @transform_9(%arg0: i32) -> (i32, i32) {
    %c0_i32 = arith.constant 0 : i32
    %c0_i32_0 = arith.constant 0 : i32
    return %arg0, %c0_i32 : i32, i32
  }
}

</mosaic_0001>

<bundles_post_ra>
// kernel: tpu_custom_call.1
= control target key start
LH: loop header
LB: loop body
LE: loop exit
PB: predicated region body
PF: predicated region fallthrough
CT: control target
= control target key end

     0   :  { %14 = vsyncpa [#allocation3], 0  ;;  %s757_s0 = inlined_call_operand.vmem [shape: f32[16,32], index: 0, kind: input, shape index: {}]   ;;  %s758_s1 = inlined_call_operand.vmem [shape: f32[16,8], index: 1, kind: input, shape index: {}]   ;;  %s759_s2 = inlined_call_operand.hbm [shape: f32[32,128], index: 2, kind: input, shape index: {}]   ;;  %s760_s3 = inlined_call_operand.vmem [shape: f32[8,128], index: 3, kind: input, shape index: {}]   ;;  %s761_s4 = inlined_call_operand.vmem [shape: f32[1,128], index: 4, kind: input, shape index: {}]   ;;  %s762_s5 = inlined_call_operand.hbm [shape: f32[128,256], index: 5, kind: input, shape index: {}]   ;;  %s763_s6 = inlined_call_operand.vmem [shape: f32[1,256], index: 6, kind: input, shape index: {}]   ;;  %s764_s7 = inlined_call_operand.hbm [shape: f32[256,128], index: 7, kind: input, shape index: {}]   ;;  %s765_s8 = inlined_call_operand.vmem [shape: f32[1,128], index: 8, kind: input, shape index: {}]   ;;  %s766_s9 = inlined_call_operand.vmem [shape: f32[16,1], index: 9, kind: output, shape index: {}]  }
   0x1   :  { %15 = vsyncpa [#allocation5], 0  ;;  %s657_s30 = smov [#allocation4]  }
   0x2   :  { %s41_s10 = sshll.u32 %s657_s30, 4  ;;  %s42_s10 = int_to_ptr.vmem [resolvable:$true] %s41_s10 }
   0x3   :  { %s601_s11 = scalar_lea.vmem %s42_s10, 4096  ;;  %p606_p1 = scmp.lt.s32.totalorder %s42_s10, %s42_s10 }
   0x4   :  { %p602_p0 = scmp.ne.s32.totalorder %s42_s10, %s601_s11  ;;  %p607_p2 = scmp.lt.s32.totalorder %s601_s11, %s601_s11 }
   0x6   :  { %p608_p3 = por %p607_p2, %p606_p1 }
   0x8   :  { %p609_p4 = pnand %p608_p3, %p602_p0 }
   0xa   :  { %612 = shalt.err (!%p609_p4)
}
   0xb   :  { %s658_s12 = smov 256   ;;  %s659_s13 = smov 16  }
   0xc   :  { %47 = dma.hbm_to_vmem [thread:$0]  %s762_s5, 4096, %s42_s10, [#allocation5], %s658_s12, %s658_s12, %s659_s13  }
   0xd   :  { %s660_s16 = smov [#allocation2]  }
   0xe   :  { %s25_s17 = sshll.u32 %s660_s16, 4  ;;  %s26_s17 = int_to_ptr.vmem [resolvable:$true] %s25_s17 }
   0xf   :  { %s621_s18 = scalar_lea.vmem %s26_s17, 512  ;;  %p626_p6 = scmp.lt.s32.totalorder %s26_s17, %s26_s17 }
  0x10   :  { %p622_p5 = scmp.ne.s32.totalorder %s26_s17, %s621_s18  ;;  %p627_p7 = scmp.lt.s32.totalorder %s621_s18, %s621_s18 }
  0x12   :  { %p628_p8 = por %p627_p7, %p626_p6 }
  0x14   :  { %p629_p9 = pnand %p628_p8, %p622_p5 }
  0x16   :  { %632 = shalt.err (!%p629_p9)
}
  0x17   :  { %s661_s19 = smov 128   ;;  %s662_s20 = smov 8  }
  0x18   :  { %31 = dma.hbm_to_vmem [thread:$0]  %s759_s2, 512, %s26_s17, [#allocation3], %s661_s19, %s661_s19, %s662_s20  }
  0x19   :  { %s663_s23 = smov [#allocation6]  }
  0x1a   :  { %s55_s24 = sshll.u32 %s663_s23, 4  ;;  %s56_s24 = int_to_ptr.vmem [resolvable:$true] %s55_s24 }
  0x1b   :  { %s641_s5 = scalar_lea.vmem %s56_s24, 4096  ;;  %p646_p11 = scmp.lt.s32.totalorder %s56_s24, %s56_s24 }
  0x1c   :  { %p642_p10 = scmp.ne.s32.totalorder %s56_s24, %s641_s5  ;;  %p647_p12 = scmp.lt.s32.totalorder %s641_s5, %s641_s5 }
  0x1e   :  { %p648_p13 = por %p647_p12, %p646_p11 }
  0x20   :  { %p649_p0 = pnand %p648_p13, %p642_p10 }
  0x22   :  { %652 = shalt.err (!%p649_p0)
}
  0x23   :  { %61 = dma.hbm_to_vmem [thread:$0]  %s764_s7, 4096, %s56_s24, [#allocation5], %s661_s19, %s661_s19, %s662_s20  }
  0x24   :  { %653 = dma.done.wait [#allocation3], 512  }
  0x25   :  { %654 = vsyncadd [#allocation3], 4294966784 }
  0x26   :  { %655 = dma.done.wait [#allocation5], 8192  }
  0x27   :  { %656 = vsyncadd [#allocation5], 4294959104  ;;  %v78_v0 = vld [vmem:[#allocation2 + $0x18] sm:$0xff]  ;;  %v77_v1 = vld [vmem:[#allocation2 + $0x10] sm:$0xff]  ;;  %vm82_vm0 = vcmask 64512   ;;  %vm164_vm1 = vcmask 261120  }
  0x28   :  { %v81_v2 = vld [vmem:[%s760_s3] sm:$0xff]  ;;  %573 = vmatprep.subr.mxu1 %v78_v0  ;;  %v80_v4 = vld [vmem:[%s758_s1 + $0x8] sm:$0xff]  ;;  %v288_v7 = vld [vmem:[#allocation4 + $0xf8] sm:$0xff]  ;;  %v664_v41 = vmov 0.0   ;;  %s665_s15 = smov 127   ;;  %vm506_vm2 = vcmask 7168  }
  0x29   :  { %568 = vmatprep.subr.mxu0 %v81_v2  ;;  %v79_v3 = vld [vmem:[%s758_s1] sm:$0xff]  ;;  %574 = vmatpush3.msra.mxu1 %v78_v0  ;;  %v76_v5 = vld [vmem:[#allocation2 + $0x8] sm:$0xff]  ;;  %v287_v9 = vld [vmem:[#allocation4 + $0xf0] sm:$0xff] }
  0x2a   :  { %569 = vmatpush3.msra.mxu0 %v81_v2  ;;  %v73_v6 = vld [vmem:[%s757_s0] sm:$0xff]  ;;  %575 = vmatprep.subr.mxu1 %v77_v1  ;;  %v286_v10 = vld [vmem:[#allocation4 + $0xe8] sm:$0xff]  ;;  %v284_v13 = vld [vmem:[#allocation4 + $0xd8] sm:$0xff] }
  0x2b   :  { %570 = vmatprep.mubr.msk.f32.mxu0 %vm82_vm0, %v79_v3  ;;  %576 = vmatpush3.msra.mxu1 %v77_v1  ;;  %v75_v8 = vld [vmem:[#allocation2] sm:$0xff]  ;;  %v74_v11 = vld [vmem:[%s757_s0 + $0x8] sm:$0xff]  ;;  %v283_v14 = vld [vmem:[#allocation4 + $0xd0] sm:$0xff] }
  0x2c   :  { %571 = vmatmul.mubr.msk.f32.vlgmr.msra.gmra.mxu0 %vm82_vm0, %v80_v4  ;;  %577 = vmatprep.subr.mxu1 %v76_v5  ;;  %v285_v12 = vld [vmem:[#allocation4 + $0xe0] sm:$0xff]  ;;  %v282_v15 = vld [vmem:[#allocation4 + $0xc8] sm:$0xff]  ;;  %v280_v17 = vld [vmem:[#allocation4 + $0xb8] sm:$0xff] }
  0x2d   :  { %581 = vmatprep.mubr.msk.f32.mxu1 %vm164_vm1, %v73_v6  ;;  %578 = vmatpush3.msra.mxu1 %v76_v5  ;;  %v281_v16 = vld [vmem:[#allocation4 + $0xc0] sm:$0xff]  ;;  %v279_v18 = vld [vmem:[#allocation4 + $0xb0] sm:$0xff]  ;;  %v278_v19 = vld [vmem:[#allocation4 + $0xa8] sm:$0xff] }
  0x2e   :  { %301 = vmatprep.subr.mxu0 %v288_v7  ;;  %579 = vmatprep.subr.mxu1 %v75_v8  ;;  %v277_v20 = vld [vmem:[#allocation4 + $0xa0] sm:$0xff]  ;;  %v276_v21 = vld [vmem:[#allocation4 + $0x98] sm:$0xff]  ;;  %v275_v22 = vld [vmem:[#allocation4 + $0x90] sm:$0xff] }
  0x2f   :  { %302 = vmatpush1.msra.mxu0 %v287_v9  ;;  %580 = vmatpush3.msra.mxu1 %v75_v8  ;;  %v274_v23 = vld [vmem:[#allocation4 + $0x88] sm:$0xff]  ;;  %v273_v24 = vld [vmem:[#allocation4 + $0x80] sm:$0xff]  ;;  %v272_v25 = vld [vmem:[#allocation4 + $0x78] sm:$0xff] }
  0x30   :  { %303 = vmatprep.subr.mxu0 %v286_v10  ;;  %582 = vmatmul.mubr.msk.f32.vlgmr.msra.gmra.mxu1 %vm164_vm1, %v74_v11  ;;  %v271_v26 = vld [vmem:[#allocation4 + $0x70] sm:$0xff]  ;;  %v270_v27 = vld [vmem:[#allocation4 + $0x68] sm:$0xff]  ;;  %v269_v28 = vld [vmem:[#allocation4 + $0x60] sm:$0xff] }
  0x31   :  { %304 = vmatpush1.msra.mxu0 %v285_v12  ;;  %v268_v29 = vld [vmem:[#allocation4 + $0x58] sm:$0xff]  ;;  %v267_v30 = vld [vmem:[#allocation4 + $0x50] sm:$0xff]  ;;  %v266_v31 = vld [vmem:[#allocation4 + $0x48] sm:$0xff]  ;;  %365 = vmatprep.mubr.f32.mxu0 %v664_v41 }
  0x32   :  { %305 = vmatprep.subr.mxu0 %v284_v13  ;;  %v265_v32 = vld [vmem:[#allocation4 + $0x40] sm:$0xff]  ;;  %v264_v33 = vld [vmem:[#allocation4 + $0x38] sm:$0xff]  ;;  %v263_v34 = vld [vmem:[#allocation4 + $0x30] sm:$0xff] }
  0x33   :  { %306 = vmatpush1.msra.mxu0 %v283_v14  ;;  %v262_v35 = vld [vmem:[#allocation4 + $0x28] sm:$0xff]  ;;  %v261_v36 = vld [vmem:[#allocation4 + $0x20] sm:$0xff]  ;;  %v260_v37 = vld [vmem:[#allocation4 + $0x18] sm:$0xff] }
  0x34   :  { %307 = vmatprep.subr.mxu0 %v282_v15  ;;  %v259_v38 = vld [vmem:[#allocation4 + $0x10] sm:$0xff]  ;;  %v258_v39 = vld [vmem:[#allocation4 + $0x8] sm:$0xff]  ;;  %v257_v40 = vld [vmem:[#allocation4] sm:$0xff] }
  0x35   :  { %308 = vmatpush1.msra.mxu0 %v281_v16  ;;  %v413_v42 = vld [vmem:[#allocation6 + $0xf8] sm:$0xff]  ;;  %v412_v44 = vld [vmem:[#allocation6 + $0xf0] sm:$0xff]  ;;  %v411_v46 = vld [vmem:[#allocation6 + $0xe8] sm:$0xff] }
  0x36   :  { %309 = vmatprep.subr.mxu0 %v280_v17  ;;  %v397_v43 = vld [vmem:[#allocation6 + $0x78] sm:$0xff]  ;;  %530 = vmatprep.subr.mxu1 %v413_v42  ;;  %v396_v45 = vld [vmem:[#allocation6 + $0x70] sm:$0xff]  ;;  %v395_v47 = vld [vmem:[#allocation6 + $0x68] sm:$0xff] }
  0x37   :  { %310 = vmatpush1.msra.mxu0 %v279_v18  ;;  %531 = vmatpush3.msra.mxu1 %v397_v43  ;;  %v410_v48 = vld [vmem:[#allocation6 + $0xe0] sm:$0xff]  ;;  %v409_v50 = vld [vmem:[#allocation6 + $0xd8] sm:$0xff]  ;;  %v408_v52 = vld [vmem:[#allocation6 + $0xd0] sm:$0xff] }
  0x38   :  { %311 = vmatprep.subr.mxu0 %v278_v19  ;;  %532 = vmatprep.subr.mxu1 %v412_v44  ;;  %v394_v49 = vld [vmem:[#allocation6 + $0x60] sm:$0xff]  ;;  %v393_v51 = vld [vmem:[#allocation6 + $0x58] sm:$0xff]  ;;  %v392_v53 = vld [vmem:[#allocation6 + $0x50] sm:$0xff] }
  0x39   :  { %312 = vmatpush1.msra.mxu0 %v277_v20  ;;  %533 = vmatpush3.msra.mxu1 %v396_v45  ;;  %v407_v54 = vld [vmem:[#allocation6 + $0xc8] sm:$0xff]  ;;  %v406_v56 = vld [vmem:[#allocation6 + $0xc0] sm:$0xff]  ;;  %v405_v58 = vld [vmem:[#allocation6 + $0xb8] sm:$0xff] }
  0x3a   :  { %313 = vmatprep.subr.mxu0 %v276_v21  ;;  %534 = vmatprep.subr.mxu1 %v411_v46  ;;  %v391_v55 = vld [vmem:[#allocation6 + $0x48] sm:$0xff]  ;;  %v390_v57 = vld [vmem:[#allocation6 + $0x40] sm:$0xff]  ;;  %v389_v59 = vld [vmem:[#allocation6 + $0x38] sm:$0xff]  ;;  %v291_v21 = vlaneseq }
  0x3b   :  { %314 = vmatpush1.msra.mxu0 %v275_v22  ;;  %535 = vmatpush3.msra.mxu1 %v395_v47  ;;  %v404_v60 = vld [vmem:[#allocation6 + $0xb0] sm:$0xff]  ;;  %v403_v62 = vld [vmem:[#allocation6 + $0xa8] sm:$0xff]  ;;  %v402_v0 = vld [vmem:[#allocation6 + $0xa0] sm:$0xff] }
  0x3c   :  { %315 = vmatprep.subr.mxu0 %v274_v23  ;;  %536 = vmatprep.subr.mxu1 %v410_v48  ;;  %v388_v61 = vld [vmem:[#allocation6 + $0x30] sm:$0xff]  ;;  %v387_v63 = vld [vmem:[#allocation6 + $0x28] sm:$0xff]  ;;  %v386_v1 = vld [vmem:[#allocation6 + $0x20] sm:$0xff]  ;;  %v292_v22 = vshrl.u32 %v291_v21, 7 }
  0x3d   :  { %316 = vmatpush1.msra.mxu0 %v273_v24  ;;  %537 = vmatpush3.msra.mxu1 %v394_v49  ;;  %v519_v8 = vld [vmem:[%s761_s4] ss:$0 sm:$0xff]  ;;  %v401_v13 = vld [vmem:[#allocation6 + $0x98] sm:$0xff]  ;;  %v400_v15 = vld [vmem:[#allocation6 + $0x90] sm:$0xff] }
  0x3e   :  { %317 = vmatprep.subr.mxu0 %v272_v25  ;;  %538 = vmatprep.subr.mxu1 %v409_v50  ;;  %v385_v14 = vld [vmem:[#allocation6 + $0x18] sm:$0xff]  ;;  %v384_v16 = vld [vmem:[#allocation6 + $0x10] sm:$0xff]  ;;  %v399_v17 = vld [vmem:[#allocation6 + $0x88] sm:$0xff]  ;;  %v293_v23 = vsub.s32 0, %v292_v22  ;;  %v297_v25 = vsub.s32 1, %v292_v22 }
  0x3f   :  { %318 = vmatpush1.msra.mxu0 %v271_v26  ;;  %539 = vmatpush3.msra.mxu1 %v393_v51  ;;  %v383_v18 = vld [vmem:[#allocation6 + $0x8] sm:$0xff]  ;;  %v398_v19 = vld [vmem:[#allocation6 + $0x80] sm:$0xff] }
  0x40   :  { %319 = vmatprep.subr.mxu0 %v270_v27  ;;  %540 = vmatprep.subr.mxu1 %v408_v52  ;;  %v382_v20 = vld [vmem:[#allocation6] sm:$0xff] }
  0x41   :  { %320 = vmatpush1.msra.mxu0 %v269_v28  ;;  %541 = vmatpush3.msra.mxu1 %v392_v53  ;;  %v289_v24 = vld [vmem:[%s763_s6] sm:$0x3] }
  0x42   :  { %321 = vmatprep.subr.mxu0 %v268_v29  ;;  %542 = vmatprep.subr.mxu1 %v407_v54  ;;  %v294_v26 = vrot.slane %v289_v24, %v293_v23  ;;  %v298_v27 = vrot.slane %v289_v24, %v297_v25  ;;  %v520_v42 = vld [vmem:[%s765_s8] ss:$0 sm:$0xff] }
  0x43   :  { %322 = vmatpush1.msra.mxu0 %v267_v30  ;;  %543 = vmatpush3.msra.mxu1 %v391_v55 }
  0x44   :  { %323 = vmatprep.subr.mxu0 %v266_v31  ;;  %544 = vmatprep.subr.mxu1 %v406_v56 }
  0x45   :  { %324 = vmatpush1.msra.mxu0 %v265_v32  ;;  %545 = vmatpush3.msra.mxu1 %v390_v57 }
  0x46   :  { %325 = vmatprep.subr.mxu0 %v264_v33  ;;  %546 = vmatprep.subr.mxu1 %v405_v58 }
  0x47   :  { %326 = vmatpush1.msra.mxu0 %v263_v34  ;;  %547 = vmatpush3.msra.mxu1 %v389_v59 }
  0x48   :  { %327 = vmatprep.subr.mxu0 %v262_v35  ;;  %548 = vmatprep.subr.mxu1 %v404_v60 }
  0x49   :  { %328 = vmatpush1.msra.mxu0 %v261_v36  ;;  %549 = vmatpush3.msra.mxu1 %v388_v61 }
  0x4a   :  { %329 = vmatprep.subr.mxu0 %v260_v37  ;;  %550 = vmatprep.subr.mxu1 %v403_v62 }
  0x4b   :  { %330 = vmatpush1.msra.mxu0 %v259_v38  ;;  %551 = vmatpush3.msra.mxu1 %v387_v63 }
  0x4c   :  { %331 = vmatprep.subr.mxu0 %v258_v39  ;;  %552 = vmatprep.subr.mxu1 %v402_v0 }
  0x4d   :  { %332 = vmatpush1.msra.mxu0 %v257_v40  ;;  %553 = vmatpush3.msra.mxu1 %v386_v1 }
  0x4e   :  { %554 = vmatprep.subr.mxu1 %v401_v13 }
  0x4f   :  { %555 = vmatpush3.msra.mxu1 %v385_v14 }
  0x50   :  { %556 = vmatprep.subr.mxu1 %v400_v15 }
  0x51   :  { %557 = vmatpush3.msra.mxu1 %v384_v16 }
  0x52   :  { %558 = vmatprep.subr.mxu1 %v399_v17 }
  0x53   :  { %559 = vmatpush3.msra.mxu1 %v383_v18 }
  0x54   :  { %560 = vmatprep.subr.mxu1 %v398_v19 }
  0x55   :  { %561 = vmatpush3.msra.mxu1 %v382_v20 }
  0xec   :  { %v572_v2 = vpop.f32.mrf.mxu0 }
  0xee   :  { %v155_v4 = vpop.f32.mrf.mxu0 }
  0xf0   :  { %v583_v3 = vpop.f32.mrf.mxu1 }
  0xf1   :  { %v243_v6 = vadd.f32 %v583_v3, %v572_v2 }
  0xf2   :  { %v237_v5 = vpop.f32.mrf.mxu1 }
  0xf3   :  { %v238_v7 = vadd.f32 %v237_v5, %v155_v4  ;;  %v254_v10 = vadd.f32 %v519_v8, %v243_v6 }
  0xf5   :  { %v253_v9 = vadd.f32 %v519_v8, %v238_v7  ;;  %v256_v12 = vmax.f32 %v254_v10, 0.0 }
  0xf7   :  { %v255_v11 = vmax.f32 %v253_v9, 0.0 }
  0xf9   :  { %366 = vmatmul.mubr.f32.vlgmr.msra.gmra.mxu0 %v255_v11 }
  0xfa   :  { %371 = vmatprep.mubr.f32.mxu0 %v664_v41 }
  0xfd   :  { %372 = vmatmul.mubr.f32.gmra.mxu0 %v256_v12 }
 0x1b9   :  { %v367_v28 = vpop.f32.mrf.mxu0 }
 0x1ba   :  { %v368_v29 = vadd.f32 %v367_v28, %v294_v26 }
 0x1bb   :  { %v369_v30 = vpop.f32.mrf.mxu0 }
 0x1bc   :  { %v370_v31 = vadd.f32 %v369_v30, %v298_v27  ;;  %v378_v34 = vmax.f32 %v368_v29, 0.0 }
 0x1bd   :  { %v373_v32 = vpop.f32.mrf.mxu0 }
 0x1be   :  { %v379_v33 = vmax.f32 %v370_v31, 0.0  ;;  %v374_v35 = vadd.f32 %v373_v32, %v294_v26 }
 0x1bf   :  { %v375_v36 = vpop.f32.mrf.mxu0 }
 0x1c0   :  { %v376_v37 = vadd.f32 %v375_v36, %v298_v27  ;;  %485 = vmatprep.mubr.f32.mxu1 %v379_v33  ;;  %v380_v39 = vmax.f32 %v374_v35, 0.0 }
 0x1c1   :  { %486 = vmatmul.mubr.f32.vlgmr.msra.gmra.mxu1 %v378_v34 }
 0x1c2   :  { %v381_v38 = vmax.f32 %v376_v37, 0.0 }
 0x1c4   :  { %490 = vmatprep.mubr.f32.mxu1 %v381_v38 }
 0x1c5   :  { %491 = vmatmul.mubr.f32.gmra.mxu1 %v380_v39 }
 0x281   :  { %v562_v40 = vpop.f32.mrf.mxu1 }
 0x283   :  { %v563_v41 = vpop.f32.mrf.mxu1 }
 0x284   :  { %v564_v43 = vadd.f32 %v563_v41, %v562_v40 }
 0x285   :  { %v565_v44 = vpop.f32.mrf.mxu1 }
 0x286   :  { %v488_v45 = vadd.f32 %v564_v43, %v520_v42 }
 0x287   :  { %v566_v46 = vpop.f32.mrf.mxu1 }
 0x288   :  { %v567_v47 = vadd.f32 %v566_v46, %v565_v44  ;;  %498 = vrot.lane.b32.xlu0 %v488_v45, %s665_s15 }
 0x28a   :  { %v493_v48 = vadd.f32 %v567_v47, %v520_v42 }
 0x28c   :  { %500 = vrot.lane.b32.xlu0 %v493_v48, %s665_s15 }
 0x2fa   :  { %v499_v49 = vpop.permute.xlu0 %498 }
 0x2fb   :  { %v504_v50 = vmin.f32 %v488_v45, %v499_v49 }
 0x2fd   :  { %507 = vst.msk [vmem:[%s766_s9] sm:$0xff] %vm506_vm2, %v504_v50 }
 0x2fe   :  { %v501_v51 = vpop.permute.xlu0 %500 }
 0x2ff   :  { %v505_v52 = vmin.f32 %v493_v48, %v501_v51 }
 0x301   :  { %508 = vst.msk [vmem:[%s766_s9 + $0x8] sm:$0xff] %vm506_vm2, %v505_v52 }
 0x302   :  { %513 = vsyncpa [#allocation3], 1 }
 0x303   :  { %514 = vsyncpa [#allocation5], 1 }

</bundles_post_ra>
